<compile_context>
chip_gen: v5e
topology: v5e:2x2
jax: 0.10.0
libtpu: 0.0.40
codegen_flags: <defaults>
</compile_context>

<pallas_src>
import functools

import jax
import jax.numpy as jnp
from jax.experimental import pallas as pl
from jax.experimental.pallas import tpu as pltpu

LANES = 128
MAX_TILE_ROWS = 1024   # (1024, 128) f32 tile = 512 KiB per input per buffer
EPS = 1e-9
PAD_LOGIT = -1e9       # sigmoid(-1e9) == 0.0 -> lane-tail padding is inert


def _dice_partial_kernel(x_ref, t_ref, o_ref, *, rows, tile_rows, steps, needs_mask):
    """Accumulate per-core partial sums of (p*t) and (p+t).

    o_ref block: (1, 2, 8, LANES). Slice [0,0] holds intersection terms,
    slice [0,1] holds union terms. The output block index is constant along
    the inner (reduction) grid axis, so the block stays resident in VMEM and
    acts as the accumulator.
    """
    c = pl.program_id(0)
    i = pl.program_id(1)

    @pl.when(i == 0)
    def _():
        o_ref[...] = jnp.zeros_like(o_ref)

    x = x_ref[...].astype(jnp.float32)
    t = t_ref[...].astype(jnp.float32)
    p = jax.nn.sigmoid(x)
    inter = p * t
    union = p + t

    if needs_mask:
        # Zero out rows past the end of the real array (partial last tile,
        # or a fully out-of-range step whose index_map was clamped).
        row0 = (c * steps + i) * tile_rows
        rid = row0 + jax.lax.broadcasted_iota(jnp.int32, (tile_rows, LANES), 0)
        valid = rid < rows
        zero = jnp.zeros_like(inter)
        inter = jnp.where(valid, inter, zero)
        union = jnp.where(valid, union, zero)

    # Fold the (tile_rows, 128) tile down to a vreg-shaped (8, 128) slab with
    # plain vector adds (VPU, hidden under the DMA); the expensive cross-lane
    # reduction to scalars runs once in the epilogue, not once per step.
    inter3 = inter.reshape(tile_rows // 8, 8, LANES)
    union3 = union.reshape(tile_rows // 8, 8, LANES)
    o_ref[0, 0, :, :] += jnp.sum(inter3, axis=0)
    o_ref[0, 1, :, :] += jnp.sum(union3, axis=0)


def dice_loss(logits: jax.Array, targets: jax.Array, eps: float = EPS) -> jax.Array:
    """Equivalent of DiceLoss().forward(logits, targets). Returns a scalar."""
    assert logits.shape == targets.shape
    n = logits.size

    # Both sums are global, so the PyTorch .view(num, -1) is irrelevant:
    # flatten everything and stream it as a lane-dense (rows, 128) slab.
    x = logits.reshape(-1)
    t = targets.reshape(-1)

    rem = n % LANES
    if rem:
        # Only the lane tail (< 128 elems) is padded; padded logits map to
        # sigmoid == 0 and padded targets are 0, so they add exactly nothing.
        pad = LANES - rem
        x = jnp.pad(x, (0, pad), constant_values=PAD_LOGIT)
        t = jnp.pad(t, (0, pad))
    rows = x.size // LANES
    x2 = x.reshape(rows, LANES)
    t2 = t.reshape(rows, LANES)

    # Static tiling decisions (shapes are known at trace time).
    tile_rows = min(MAX_TILE_ROWS, pl.cdiv(rows, 8) * 8)
    tiles = pl.cdiv(rows, tile_rows)
    n_cores = 2 if tiles >= 2 else 1          # megacore split only if useful
    steps = pl.cdiv(tiles, n_cores)
    needs_clamp = n_cores * steps != tiles     # at most one OOB grid step
    needs_mask = n_cores * steps * tile_rows != rows

    if needs_clamp:
        def in_idx(c, i):
            return (jnp.minimum(c * steps + i, tiles - 1), 0)
    else:
        def in_idx(c, i):
            return (c * steps + i, 0)

    in_spec = pl.BlockSpec((tile_rows, LANES), in_idx)

    kernel = functools.partial(
        _dice_partial_kernel,
        rows=rows, tile_rows=tile_rows, steps=steps, needs_mask=needs_mask,
    )

    out = pl.pallas_call(
        kernel,
        out_shape=jax.ShapeDtypeStruct((n_cores, 2, 8, LANES), jnp.float32),
        grid_spec=pltpu.PrefetchScalarGridSpec(
            num_scalar_prefetch=0,
            grid=(n_cores, steps),
            in_specs=[in_spec, in_spec],
            out_specs=pl.BlockSpec((1, 2, 8, LANES), lambda c, i: (c, 0, 0, 0)),
        ),
        compiler_params=pltpu.CompilerParams(
            # Split tiles across TensorCores on v7x; sequential carried
            # reduction along the inner axis.
            dimension_semantics=("parallel", "arbitrary"),
            # Actual usage: 2 inputs x 2 buffers x <=512 KiB + 8 KiB out ~ 2 MiB;
            # limit fits v5e/v6e/v7x alike.
            vmem_limit_bytes=32 * 1024 * 1024,
        ),
    )(x2, t2)

    # Tiny epilogue: reduce the (n_cores, 2, 8, 128) partials to the scalar loss.
    intersection = 2.0 * jnp.sum(out[:, 0])
    union = jnp.sum(out[:, 1])
    dice_score = (intersection + jnp.float32(eps)) / union
    return (1.0 - dice_score).astype(jnp.float32)


def _reference(logits, targets, eps=EPS):
    # Mirrors PyTorch DiceLoss.forward exactly (eps only in the numerator).
    p = jax.nn.sigmoid(logits.astype(jnp.float32))
    t = targets.astype(jnp.float32)
    intersection = 2.0 * jnp.sum(p * t)
    union = jnp.sum(p) + jnp.sum(t)
    return 1.0 - (intersection + eps) / union


if __name__ == "__main__":
    key = jax.random.PRNGKey(0)

    # Primary small NCHW-shaped example: batch=2, channels=4, spatial=16x16.
    cases = [
        (2, 4, 16, 16),      # aligned: no pad, no mask
        (2, 3, 17, 19),      # ragged: lane-tail pad + row mask
        (5, 4, 128, 128),    # multi-tile: megacore split + clamped index_map
    ]
    for shape in cases:
        key, k1, k2 = jax.random.split(key, 3)
        logits = jax.random.normal(k1, shape, dtype=jnp.float32)
        targets = (jax.random.uniform(k2, shape) > 0.5).astype(jnp.float32)

        loss = jax.block_until_ready(dice_loss(logits, targets))
        ref = jax.block_until_ready(_reference(logits, targets))
        assert jnp.allclose(loss, ref, rtol=1e-5, atol=1e-5), (shape, loss, ref)

    print("KERNEL_OK")
</pallas_src>

<mosaic_0001>
module attributes {stable_mosaic.version = 11 : i64} {
  func.func @_dice_partial_kernel(%arg0: i32, %arg1: i32, %arg2: memref<16x128xf32, #tpu.memory_space<vmem>>, %arg3: memref<16x128xf32, #tpu.memory_space<vmem>>, %arg4: memref<1x2x8x128xf32, #tpu.memory_space<vmem>>) attributes {dimension_semantics = [#tpu.dimension_semantics<parallel>, #tpu.dimension_semantics<arbitrary>], iteration_bounds = array<i64: 1, 1>, scalar_prefetch = 0 : i64, scratch_operands = 0 : i64, tpu.core_type = #tpu.core_type<tc>, window_params = [{transform_indices = @transform_0, window_bounds = array<i64: 16, 128>}, {transform_indices = @transform_1, window_bounds = array<i64: 16, 128>}, {transform_indices = @transform_2, window_bounds = array<i64: 1, 2, 8, 128>}]} {
    %c0_i32 = arith.constant 0 : i32
    %0 = arith.cmpi eq, %arg1, %c0_i32 : i32
    %1 = arith.extui %0 : i1 to i32
    %c0_i32_0 = arith.constant 0 : i32
    %2 = arith.cmpi ne, %1, %c0_i32_0 : i32
    scf.if %2 {
      %cst_21 = arith.constant 0.000000e+00 : f32
      %28 = vector.broadcast %cst_21 : f32 to vector<1x2x8x128xf32>
      %c0_22 = arith.constant 0 : index
      %c0_23 = arith.constant 0 : index
      %c0_24 = arith.constant 0 : index
      %c0_25 = arith.constant 0 : index
      %29 = vector.load %arg4[%c0_22, %c0_23, %c0_24, %c0_25] : memref<1x2x8x128xf32, #tpu.memory_space<vmem>>, vector<1x2x8x128xf32>
      tpu.vector_store %arg4[%c0_22, %c0_23, %c0_24, %c0_25], %28 {strides = array<i32>} : memref<1x2x8x128xf32, #tpu.memory_space<vmem>>, vector<1x2x8x128xf32>,
    } else {
    }
    %c0 = arith.constant 0 : index
    %c0_1 = arith.constant 0 : index
    %3 = vector.load %arg2[%c0, %c0_1] : memref<16x128xf32, #tpu.memory_space<vmem>>, vector<16x128xf32>
    %c0_2 = arith.constant 0 : index
    %c0_3 = arith.constant 0 : index
    %4 = vector.load %arg3[%c0_2, %c0_3] : memref<16x128xf32, #tpu.memory_space<vmem>>, vector<16x128xf32>
    %5 = arith.negf %3 : vector<16x128xf32>
    %6 = math.exp %5 : vector<16x128xf32>
    %cst = arith.constant 1.000000e+00 : f32
    %7 = vector.broadcast %cst : f32 to vector<16x128xf32>
    %8 = arith.addf %7, %6 : vector<16x128xf32>
    %9 = arith.divf %7, %8 : vector<16x128xf32>
    %10 = arith.mulf %9, %4 : vector<16x128xf32>
    %11 = arith.addf %9, %4 : vector<16x128xf32>
    %12 = vector.shape_cast %10 : vector<16x128xf32> to vector<2x8x128xf32>
    %13 = vector.shape_cast %11 : vector<16x128xf32> to vector<2x8x128xf32>
    %c0_4 = arith.constant 0 : index
    %c0_5 = arith.constant 0 : index
    %c0_6 = arith.constant 0 : index
    %c0_7 = arith.constant 0 : index
    %14 = vector.load %arg4[%c0_4, %c0_5, %c0_6, %c0_7] : memref<1x2x8x128xf32, #tpu.memory_space<vmem>>, vector<1x1x8x128xf32>
    %15 = vector.shape_cast %14 : vector<1x1x8x128xf32> to vector<8x128xf32>
    %cst_8 = arith.constant dense<0.000000e+00> : vector<8x128xf32>
    %16 = vector.multi_reduction <add>, %12, %cst_8 [0] : vector<2x8x128xf32> to vector<8x128xf32>
    %17 = arith.addf %15, %16 : vector<8x128xf32>
    %c0_9 = arith.constant 0 : index
    %c0_10 = arith.constant 0 : index
    %c0_11 = arith.constant 0 : index
    %c0_12 = arith.constant 0 : index
    %18 = vector.load %arg4[%c0_9, %c0_10, %c0_11, %c0_12] : memref<1x2x8x128xf32, #tpu.memory_space<vmem>>, vector<1x1x8x128xf32>
    %19 = vector.shape_cast %18 : vector<1x1x8x128xf32> to vector<8x128xf32>
    %20 = vector.shape_cast %17 : vector<8x128xf32> to vector<1x1x8x128xf32>
    tpu.vector_store %arg4[%c0_9, %c0_10, %c0_11, %c0_12], %20 {strides = array<i32>} : memref<1x2x8x128xf32, #tpu.memory_space<vmem>>, vector<1x1x8x128xf32>,
    %c0_13 = arith.constant 0 : index
    %c1 = arith.constant 1 : index
    %c0_14 = arith.constant 0 : index
    %c0_15 = arith.constant 0 : index
    %21 = vector.load %arg4[%c0_13, %c1, %c0_14, %c0_15] : memref<1x2x8x128xf32, #tpu.memory_space<vmem>>, vector<1x1x8x128xf32>
    %22 = vector.shape_cast %21 : vector<1x1x8x128xf32> to vector<8x128xf32>
    %cst_16 = arith.constant dense<0.000000e+00> : vector<8x128xf32>
    %23 = vector.multi_reduction <add>, %13, %cst_16 [0] : vector<2x8x128xf32> to vector<8x128xf32>
    %24 = arith.addf %22, %23 : vector<8x128xf32>
    %c0_17 = arith.constant 0 : index
    %c1_18 = arith.constant 1 : index
    %c0_19 = arith.constant 0 : index
    %c0_20 = arith.constant 0 : index
    %25 = vector.load %arg4[%c0_17, %c1_18, %c0_19, %c0_20] : memref<1x2x8x128xf32, #tpu.memory_space<vmem>>, vector<1x1x8x128xf32>
    %26 = vector.shape_cast %25 : vector<1x1x8x128xf32> to vector<8x128xf32>
    %27 = vector.shape_cast %24 : vector<8x128xf32> to vector<1x1x8x128xf32>
    tpu.vector_store %arg4[%c0_17, %c1_18, %c0_19, %c0_20], %27 {strides = array<i32>} : memref<1x2x8x128xf32, #tpu.memory_space<vmem>>, vector<1x1x8x128xf32>,
    return
  }
  func.func @transform_0(%arg0: i32, %arg1: i32) -> (i32, i32) {
    %c1_i32 = arith.constant 1 : i32
    %0 = arith.muli %arg0, %c1_i32 : i32
    %1 = arith.addi %0, %arg1 : i32
    %c0_i32 = arith.constant 0 : i32
    %c0_i32_0 = arith.constant 0 : i32
    return %1, %c0_i32 : i32, i32
  }
  func.func @transform_1(%arg0: i32, %arg1: i32) -> (i32, i32) {
    %c1_i32 = arith.constant 1 : i32
    %0 = arith.muli %arg0, %c1_i32 : i32
    %1 = arith.addi %0, %arg1 : i32
    %c0_i32 = arith.constant 0 : i32
    %c0_i32_0 = arith.constant 0 : i32
    return %1, %c0_i32 : i32, i32
  }
  func.func @transform_2(%arg0: i32, %arg1: i32) -> (i32, i32, i32, i32) {
    %c0_i32 = arith.constant 0 : i32
    %c0_i32_0 = arith.constant 0 : i32
    %c0_i32_1 = arith.constant 0 : i32
    %c0_i32_2 = arith.constant 0 : i32
    return %arg0, %c0_i32, %c0_i32_0, %c0_i32_1 : i32, i32, i32, i32
  }
}

</mosaic_0001>

<bundles_post_ra>
// kernel: tpu_custom_call.1
= control target key start
LH: loop header
LB: loop body
LE: loop exit
PB: predicated region body
PF: predicated region fallthrough
CT: control target
= control target key end

     0   :  { %7 = vsyncpa [#allocation3], 0  ;;  %s269_s0 = inlined_call_operand.hbm [shape: f32[16,128], index: 0, kind: input, shape index: {}]   ;;  %s270_s1 = inlined_call_operand.hbm [shape: f32[16,128], index: 1, kind: input, shape index: {}]   ;;  %s271_s2 = inlined_call_operand.hbm [shape: f32[1,2,8,128], index: 2, kind: output, shape index: {}]  }
   0x1   :  { %8 = vsyncpa [#allocation6], 0 }
   0x2   :  { %9 = vsyncpa [#allocation4], 0  ;;  %s18_s11 = sshll.u32 %s269_s0, 4  ;;  %s231_s12 = smov [#allocation2]   ;;  %s19_s11 = int_to_ptr.hbm [resolvable:$true] %s18_s11 }
   0x3   :  { %s20_s13 = sshll.u32 %s231_s12, 4  ;;  %s35_s16 = sshll.u32 %s270_s1, 4  ;;  %s21_s13 = int_to_ptr.vmem [resolvable:$true] %s20_s13  ;;  %s36_s16 = int_to_ptr.hbm [resolvable:$true] %s35_s16 }
   0x4   :  { %s232_s17 = smov 128   ;;  %s233_s18 = smov 8  }
   0x5   :  { %26 = dma.hbm_to_vmem [thread:$0]  %s19_s11, 256, %s21_s13, [#allocation3], %s232_s17, %s232_s17, %s233_s18  }
   0x6   :  { %s234_s19 = smov [#allocation5]  }
   0x7   :  { %s37_s20 = sshll.u32 %s234_s19, 4  ;;  %s38_s20 = int_to_ptr.vmem [resolvable:$true] %s37_s20 }
   0x8   :  { %43 = dma.hbm_to_vmem [thread:$0]  %s36_s16, 256, %s38_s20, [#allocation6], %s232_s17, %s232_s17, %s233_s18  }
   0x9   :  { %225 = dma.done.wait [#allocation3], 256  }
   0xa   :  { %226 = vsyncadd [#allocation3], 4294967040 }
   0xb   :  { %227 = dma.done.wait [#allocation6], 256  }
   0xc   :  { %228 = vsyncadd [#allocation6], 4294967040  ;;  %v62_v0 = vld [vmem:[#allocation2] sm:$0xff]  ;;  %v63_v1 = vld [vmem:[#allocation2 + $0x8] sm:$0xff]  ;;  %s235_s0 = smov [#allocation7]   ;;  %s123_s23 = sshll.u32 %s271_s2, 4  ;;  %s124_s23 = int_to_ptr.hbm [resolvable:$true] %s123_s23 }
   0xd   :  { %v137_v2 = vmul.f32 -1.442695, %v62_v0  ;;  %v138_v3 = vmul.f32 -1.442695, %v63_v1  ;;  %v64_v23 = vld [vmem:[#allocation5] sm:$0xff]  ;;  %v65_v25 = vld [vmem:[#allocation5 + $0x8] sm:$0xff] }
   0xe   :  { %s121_s1 = sshll.u32 %s235_s0, 4  ;;  %s122_s1 = int_to_ptr.vmem [resolvable:$true] %s121_s1 }
   0xf   :  { %145 = vpow2.f32 %v137_v2 }
  0x10   :  { %147 = vpow2.f32 %v138_v3 }
  0x15   :  { %v146_v4 = vpop.eup %145 }
  0x16   :  { %v148_v5 = vpop.eup %147  ;;  %v72_v6 = vadd.f32 1.0, %v146_v4 }
  0x17   :  { %v73_v7 = vadd.f32 1.0, %v148_v5 }
  0x18   :  { %149 = vrcp.f32 %v72_v6  ;;  %vm79_vm0 = vweird.f32 %v72_v6  ;;  %v85_v11 = vand.u32 2147483648, %v72_v6  ;;  %v83_v14 = vand.u32 2147483647, %v72_v6 }
  0x19   :  { %151 = vrcp.f32 %v73_v7  ;;  %v100_v15 = vand.u32 2147483648, %v73_v7  ;;  %vm94_vm2 = vweird.f32 %v73_v7  ;;  %v98_v17 = vand.u32 2147483647, %v73_v7 }
  0x1a   :  { %v86_v19 = vor.u32 1.1754944e-38, %v85_v11  ;;  %vm84_vm5 = vcmp.eq.f32.partialorder %v83_v14, 8.507059e+37 }
  0x1b   :  { %v101_v22 = vor.u32 1.1754944e-38, %v100_v15  ;;  %vm99_vm7 = vcmp.eq.f32.partialorder %v98_v17, 8.507059e+37 }
  0x1e   :  { %v150_v8 = vpop.eup %149 }
  0x1f   :  { %v152_v9 = vpop.eup %151  ;;  %v75_v10 = vmul.f32 %v150_v8, %v72_v6  ;;  %vm80_vm1 = vweird.f32 %v150_v8 }
  0x20   :  { %v90_v12 = vmul.f32 %v152_v9, %v73_v7  ;;  %vm95_vm3 = vweird.f32 %v152_v9  ;;  %vm81_vm4 = vmor %vm79_vm0, %vm80_vm1 }
  0x21   :  { %v76_v13 = vsub.f32 1.0, %v75_v10  ;;  %vm96_vm6 = vmor %vm94_vm2, %vm95_vm3 }
  0x22   :  { %v91_v16 = vsub.f32 1.0, %v90_v12 }
  0x23   :  { %v77_v18 = vmul.f32 %v150_v8, %v76_v13 }
  0x24   :  { %v92_v20 = vmul.f32 %v152_v9, %v91_v16 }
  0x25   :  { %v78_v21 = vadd.f32 %v150_v8, %v77_v18 }
  0x26   :  { %v93_v24 = vadd.f32 %v152_v9, %v92_v20 }
  0x27   :  { %v82_v26 = vsel %vm81_vm4, %v150_v8, %v78_v21 }
  0x28   :  { %v87_v27 = vsel %vm84_vm5, %v86_v19, %v82_v26  ;;  %v97_v28 = vsel %vm96_vm6, %v152_v9, %v93_v24 }
  0x29   :  { %v102_v29 = vsel %vm99_vm7, %v101_v22, %v97_v28  ;;  %v104_v30 = vmul.f32 %v87_v27, %v64_v23  ;;  %v106_v31 = vadd.f32 %v87_v27, %v64_v23 }
  0x2a   :  { %v105_v32 = vmul.f32 %v102_v29, %v65_v25  ;;  %v107_v33 = vadd.f32 %v102_v29, %v65_v25 }
  0x2c   :  { %v109_v34 = vadd.f32 %v105_v32, %v104_v30  ;;  %v114_v35 = vadd.f32 %v107_v33, %v106_v31 }
  0x2e   :  { %111 = vst [vmem:[#allocation7] sm:$0xff] %v109_v34 }
  0x2f   :  { %116 = vst [vmem:[#allocation7 + $0x8] sm:$0xff] %v114_v35 }
  0x30   :  { %129 = dma.vmem_to_hbm [thread:$0]  %s122_s1, 256, %s124_s23, [#allocation4], %s232_s17, %s232_s17, %s233_s18  }
  0x31   :  { %229 = dma.done.wait [#allocation4], 256  }
  0x32   :  { %230 = vsyncadd [#allocation4], 4294967040 }
  0x33   :  { %134 = vsyncpa [#allocation3], 1 }
  0x34   :  { %135 = vsyncpa [#allocation6], 1 }
  0x35   :  { %136 = vsyncpa [#allocation4], 1 }

</bundles_post_ra>
